<compile_context>
chip_gen: v6e
topology: v6e:2x2x1
jax: 0.10.0
libtpu: 0.0.40
codegen_flags: <defaults>
</compile_context>

<pallas_src>
import jax
import jax.numpy as jnp
from jax import lax
from jax.experimental import pallas as pl
from jax.experimental.pallas import tpu as pltpu

FIXED_OUT = 100                        # fixed leading dim of the output (torch contract)
PAD_OUT = ((FIXED_OUT + 7) // 8) * 8   # 104: sublane-aligned internal row window


def _kernel(n_ref, x_ref, w_ref, b_ref, o_ref):
    """Fused inner-Linear + fixed-100-row expansion.

    n_ref : SMEM (1,)        int32 -- n_valid = min(N, 100)
    x_ref : VMEM (104, D)    f32   -- input row window (rows >= n_valid are pad/junk)
    w_ref : VMEM (D, H)      f32
    b_ref : VMEM (1, H)      f32
    o_ref : VMEM (1, 100, H) f32
    """
    # Inner model (Linear) on the MXU with f32 accumulation; bias folded into
    # the same epilogue pass.
    y = jnp.dot(x_ref[...], w_ref[...], preferred_element_type=jnp.float32)
    y = y + b_ref[...]                               # (1, H) broadcasts over rows

    # Unconditional row mask: rows >= n_valid (zero-padded / unread rows that
    # would otherwise carry the bias) are forced to exactly 0, matching
    # torch.zeros(100, ...).  Cheap VPU filler hidden under the MXU.
    row_ids = lax.broadcasted_iota(jnp.int32, y.shape, 0)
    y = jnp.where(row_ids < n_ref[0], y, 0.0)

    # Single store of the 100 valid output rows (block == full output array);
    # rows 100..103 of the internal window are simply never stored.
    o_ref[0] = y[:FIXED_OUT, :].astype(o_ref.dtype)


@jax.jit
def end2end_rv_fixed_output(x, w, b):
    """x: [N, D] f32, w: [D, H] f32, b: [1, H] f32 -> [1, 100, H] f32."""
    N, D = x.shape
    H = w.shape[1]

    n_valid = min(N, FIXED_OUT)

    # Kernel always consumes a fixed 104-row window of x:
    #  * N >= 104: the BlockSpec window covers rows 0..103 directly -> no
    #    wrapper copy at all (rows beyond 100 never reach the output).
    #  * N <  104: one small pad to 104 rows (single op under jit); padded
    #    rows are masked to zero in-kernel.
    if N < PAD_OUT:
        x = jnp.pad(x, ((0, PAD_OUT - N), (0, 0)))

    n_arr = jnp.full((1,), n_valid, dtype=jnp.int32)

    return pl.pallas_call(
        _kernel,
        out_shape=jax.ShapeDtypeStruct((1, FIXED_OUT, H), jnp.float32),
        in_specs=[
            pl.BlockSpec(memory_space=pltpu.MemorySpace.SMEM),   # n_valid scalar
            pl.BlockSpec((PAD_OUT, D), lambda: (0, 0)),          # x row window
            pl.BlockSpec((D, H), lambda: (0, 0)),                # W
            pl.BlockSpec((1, H), lambda: (0, 0)),                # b
        ],
        out_specs=pl.BlockSpec((1, FIXED_OUT, H), lambda: (0, 0, 0)),
    )(n_arr, x, w, b)


def _reference(x, w, b):
    y = x @ w + b
    n = min(FIXED_OUT, x.shape[0])
    exp = jnp.zeros((FIXED_OUT, y.shape[1]), dtype=jnp.float32)
    exp = exp.at[:n].set(y[:n])
    return exp[None]


if __name__ == "__main__":
    # Small shapes: N=8 "detections", D=32 input features, H=32 hidden.
    N, D, H = 8, 32, 32
    key = jax.random.PRNGKey(0)
    kx, kw, kb = jax.random.split(key, 3)

    x = jax.random.normal(kx, (N, D), dtype=jnp.float32)
    w = jax.random.normal(kw, (D, H), dtype=jnp.float32) * 0.05
    b = jax.random.normal(kb, (1, H), dtype=jnp.float32) * 0.01

    out = jax.block_until_ready(end2end_rv_fixed_output(x, w, b))
    ref = _reference(x, w, b)
    assert out.shape == (1, FIXED_OUT, H), out.shape
    assert jnp.allclose(out, ref, atol=1e-5, rtol=1e-5), "mismatch vs reference"

    # Truncation path (N > 100): exercises the copy-free BlockSpec window.
    N2 = 160
    x2 = jax.random.normal(jax.random.PRNGKey(1), (N2, D), dtype=jnp.float32)
    out2 = jax.block_until_ready(end2end_rv_fixed_output(x2, w, b))
    ref2 = _reference(x2, w, b)
    assert out2.shape == (1, FIXED_OUT, H), out2.shape
    assert jnp.allclose(out2, ref2, atol=1e-5, rtol=1e-5), "mismatch (N>100)"

    print("KERNEL_OK")
</pallas_src>

<mosaic_0001>
module attributes {stable_mosaic.version = 11 : i64} {
  func.func @_kernel(%arg0: memref<1xi32, #tpu.memory_space<smem>>, %arg1: memref<104x32xf32, #tpu.memory_space<vmem>>, %arg2: memref<32x32xf32, #tpu.memory_space<vmem>>, %arg3: memref<1x32xf32, #tpu.memory_space<vmem>>, %arg4: memref<1x100x32xf32, #tpu.memory_space<vmem>>) attributes {dimension_semantics = [], scalar_prefetch = 0 : i64, scratch_operands = 0 : i64, tpu.core_type = #tpu.core_type<tc>} {
    %c0 = arith.constant 0 : index
    %c0_0 = arith.constant 0 : index
    %0 = vector.load %arg1[%c0, %c0_0] : memref<104x32xf32, #tpu.memory_space<vmem>>, vector<104x32xf32>
    %c0_1 = arith.constant 0 : index
    %c0_2 = arith.constant 0 : index
    %1 = vector.load %arg2[%c0_1, %c0_2] : memref<32x32xf32, #tpu.memory_space<vmem>>, vector<32x32xf32>
    %cst = arith.constant dense<0.000000e+00> : vector<104x32xf32>
    %2 = tpu.matmul %0, %1, %cst {dimension_numbers = #tpu.dot_dimension_numbers<[1], [0], [0], [1], [0, 0, 1, 1], [], []>} : vector<104x32xf32>, vector<32x32xf32>, vector<104x32xf32> -> vector<104x32xf32>
    %c0_3 = arith.constant 0 : index
    %c0_4 = arith.constant 0 : index
    %3 = vector.load %arg3[%c0_3, %c0_4] : memref<1x32xf32, #tpu.memory_space<vmem>>, vector<1x32xf32>
    %4 = vector.broadcast %3 : vector<1x32xf32> to vector<104x32xf32>
    %5 = arith.addf %2, %4 : vector<104x32xf32>
    %6 = tpu.iota {dimensions = array<i32: 0>} : vector<104x32xi32>
    %c0_5 = arith.constant 0 : index
    %7 = memref.load %arg0[%c0_5] : memref<1xi32, #tpu.memory_space<smem>>
    %8 = vector.broadcast %7 : i32 to vector<104x32xi32>
    %9 = arith.cmpi slt, %6, %8 : vector<104x32xi32>
    %cst_6 = arith.constant 0.000000e+00 : f32
    %10 = vector.broadcast %cst_6 : f32 to vector<104x32xf32>
    %11 = arith.select %9, %5, %10 : vector<104x32xi1>, vector<104x32xf32>
    %12 = vector.extract_strided_slice %11 {offsets = [0, 0], sizes = [100, 32], strides = [1, 1]} : vector<104x32xf32> to vector<100x32xf32>
    %c0_7 = arith.constant 0 : index
    %c0_8 = arith.constant 0 : index
    %c0_9 = arith.constant 0 : index
    %13 = vector.load %arg4[%c0_7, %c0_8, %c0_9] : memref<1x100x32xf32, #tpu.memory_space<vmem>>, vector<1x100x32xf32>
    %14 = vector.shape_cast %13 : vector<1x100x32xf32> to vector<100x32xf32>
    %15 = vector.shape_cast %12 : vector<100x32xf32> to vector<1x100x32xf32>
    tpu.vector_store %arg4[%c0_7, %c0_8, %c0_9], %15 {strides = array<i32>} : memref<1x100x32xf32, #tpu.memory_space<vmem>>, vector<1x100x32xf32>,
    return
  }
}

</mosaic_0001>

<bundles_post_ra>
// kernel: end2end_rv_fixed_output.1
= control target key start
LH: loop header
LB: loop body
LE: loop exit
PB: predicated region body
PF: predicated region fallthrough
CT: control target
= control target key end

     0   :  { %v360_v0 = vmov 0.0   ;;  %vm42_vm0 = vcmask 261120   ;;  %vm361_vm1 = vmmov 0   ;;  %v212_v18 = vlaneseq  ;;  %s566_s2 = inlined_call_operand.vmem [shape: f32[32,32], index: 2, kind: input, shape index: {}]   ;;  %s567_s1 = inlined_call_operand.vmem [shape: f32[104,32], index: 1, kind: input, shape index: {}]   ;;  %s568_s0 = inlined_call_operand.<no memory space> [shape: s32[1], index: 0, kind: input, shape index: {}]   ;;  %s569_s3 = inlined_call_operand.vmem [shape: f32[1,32], index: 3, kind: input, shape index: {}]   ;;  %s570_s4 = inlined_call_operand.vmem [shape: f32[1,100,32], index: 4, kind: output, shape index: {}]  }
   0x1   :  { %303 = vmatprep.subr.mxu0 %v360_v0  ;;  %v34_v1 = vld [vmem:[%s566_s2 + $0x18] sm:$0xff]  ;;  %350 = vmatprep.subr.mxu1 %v360_v0  ;;  %v33_v2 = vld [vmem:[%s566_s2 + $0x10] sm:$0xff]  ;;  %v32_v3 = vld [vmem:[%s566_s2 + $0x8] sm:$0xff]  ;;  %v469_v20 = vstv %s568_s0  ;;  %vm266_vm14 = vcmask 257024  }
   0x2   :  { %304 = vmatpush3.msra.mxu0 %v34_v1  ;;  %354 = vmatpush3.msra.mxu1 %v34_v1  ;;  %v31_v4 = vld [vmem:[%s566_s2] sm:$0xff]  ;;  %v25_v6 = vld [vmem:[%s567_s1 + $0x38] sm:$0xff]  ;;  %v19_v7 = vld [vmem:[%s567_s1 + $0x8] sm:$0xff]  ;;  %v464_v19 = vshrl.u32 %v212_v18, 7 }
   0x3   :  { %305 = vmatprep.subr.mxu0 %v360_v0  ;;  %351 = vmatprep.subr.mxu1 %v360_v0  ;;  %v18_v5 = vld [vmem:[%s567_s1] sm:$0xff]  ;;  %v20_v9 = vld [vmem:[%s567_s1 + $0x10] sm:$0xff]  ;;  %v27_v10 = vld [vmem:[%s567_s1 + $0x48] sm:$0xff] }
   0x4   :  { %306 = vmatpush3.msra.mxu0 %v33_v2  ;;  %355 = vmatpush3.msra.mxu1 %v33_v2  ;;  %v26_v8 = vld [vmem:[%s567_s1 + $0x40] sm:$0xff]  ;;  %v21_v11 = vld [vmem:[%s567_s1 + $0x18] sm:$0xff]  ;;  %v28_v12 = vld [vmem:[%s567_s1 + $0x50] sm:$0xff]  ;;  %v220_v22 = vadd.s32 56, %v464_v19  ;;  %vm228_vm2 = vcmp.lt.s32.totalorder %v464_v19, %v469_v20  ;;  %v214_v24 = vadd.s32 8, %v464_v19  ;;  %v221_v28 = vadd.s32 64, %v464_v19 }
   0x5   :  { %307 = vmatprep.subr.mxu0 %v360_v0  ;;  %352 = vmatprep.subr.mxu1 %v360_v0  ;;  %v22_v13 = vld [vmem:[%s567_s1 + $0x20] sm:$0xff]  ;;  %v29_v14 = vld [vmem:[%s567_s1 + $0x58] sm:$0xff]  ;;  %v23_v15 = vld [vmem:[%s567_s1 + $0x28] sm:$0xff]  ;;  %v215_v33 = vadd.s32 16, %v464_v19  ;;  %v222_v38 = vadd.s32 72, %v464_v19  ;;  %v216_v43 = vadd.s32 24, %v464_v19 }
   0x6   :  { %308 = vmatpush3.msra.mxu0 %v32_v3  ;;  %356 = vmatpush3.msra.mxu1 %v32_v3  ;;  %v30_v16 = vld [vmem:[%s567_s1 + $0x60] sm:$0xff]  ;;  %v24_v17 = vld [vmem:[%s567_s1 + $0x30] sm:$0xff]  ;;  %vm235_vm3 = vcmp.lt.s32.totalorder %v220_v22, %v469_v20  ;;  %vm229_vm4 = vcmp.lt.s32.totalorder %v214_v24, %v469_v20  ;;  %vm236_vm5 = vcmp.lt.s32.totalorder %v221_v28, %v469_v20  ;;  %v223_v48 = vadd.s32 80, %v464_v19 }
   0x7   :  { %309 = vmatprep.subr.mxu0 %v360_v0  ;;  %311 = vmatprep.mubr.msk.f32.mxu0 %vm361_vm1, %v360_v0  ;;  %v474_v21 = vld [vmem:[%s569_s3] ss:$0 sm:$0xff]  ;;  %vm230_vm6 = vcmp.lt.s32.totalorder %v215_v33, %v469_v20  ;;  %vm237_vm7 = vcmp.lt.s32.totalorder %v222_v38, %v469_v20  ;;  %vm231_vm8 = vcmp.lt.s32.totalorder %v216_v43, %v469_v20  ;;  %v217_v53 = vadd.s32 32, %v464_v19 }
   0x8   :  { %310 = vmatpush3.msra.mxu0 %v31_v4  ;;  %353 = vmatprep.subr.mxu1 %v360_v0  ;;  %vm238_vm9 = vcmp.lt.s32.totalorder %v223_v48, %v469_v20  ;;  %v224_v58 = vadd.s32 88, %v464_v19  ;;  %v218_v63 = vadd.s32 40, %v464_v19 }
   0x9   :  { %312 = vmatmul.mubr.msk.f32.vlgmr.msra.gmra.mxu0 %vm42_vm0, %v18_v5  ;;  %357 = vmatpush3.msra.mxu1 %v31_v4  ;;  %vm232_vm10 = vcmp.lt.s32.totalorder %v217_v53, %v469_v20  ;;  %v225_v4 = vadd.s32 96, %v464_v19 }
   0xa   :  { %332 = vmatprep.mubr.msk.f32.mxu1 %vm361_vm1, %v360_v0  ;;  %314 = vmatprep.mubr.msk.f32.mxu0 %vm361_vm1, %v360_v0  ;;  %vm239_vm11 = vcmp.lt.s32.totalorder %v224_v58, %v469_v20  ;;  %vm233_vm12 = vcmp.lt.s32.totalorder %v218_v63, %v469_v20 }
   0xb   :  { %333 = vmatmul.mubr.msk.f32.vlgmr.msra.gmra.mxu1 %vm42_vm0, %v25_v6  ;;  %vm240_vm13 = vcmp.lt.s32.totalorder %v225_v4, %v469_v20 }
   0xc   :  { %335 = vmatprep.mubr.msk.f32.mxu1 %vm361_vm1, %v360_v0 }
   0xd   :  { %315 = vmatmul.mubr.msk.f32.gmra.mxu0 %vm42_vm0, %v19_v7 }
   0xe   :  { %317 = vmatprep.mubr.msk.f32.mxu0 %vm361_vm1, %v360_v0 }
   0xf   :  { %336 = vmatmul.mubr.msk.f32.gmra.mxu1 %vm42_vm0, %v26_v8 }
  0x10   :  { %338 = vmatprep.mubr.msk.f32.mxu1 %vm361_vm1, %v360_v0 }
  0x11   :  { %318 = vmatmul.mubr.msk.f32.gmra.mxu0 %vm42_vm0, %v20_v9  ;;  %v219_v9 = vadd.s32 48, %v464_v19 }
  0x12   :  { %320 = vmatprep.mubr.msk.f32.mxu0 %vm361_vm1, %v360_v0 }
  0x13   :  { %339 = vmatmul.mubr.msk.f32.gmra.mxu1 %vm42_vm0, %v27_v10  ;;  %vm234_vm15 = vcmp.lt.s32.totalorder %v219_v9, %v469_v20 }
  0x14   :  { %341 = vmatprep.mubr.msk.f32.mxu1 %vm361_vm1, %v360_v0 }
  0x15   :  { %321 = vmatmul.mubr.msk.f32.gmra.mxu0 %vm42_vm0, %v21_v11 }
  0x16   :  { %323 = vmatprep.mubr.msk.f32.mxu0 %vm361_vm1, %v360_v0 }
  0x17   :  { %342 = vmatmul.mubr.msk.f32.gmra.mxu1 %vm42_vm0, %v28_v12 }
  0x18   :  { %344 = vmatprep.mubr.msk.f32.mxu1 %vm361_vm1, %v360_v0 }
  0x19   :  { %324 = vmatmul.mubr.msk.f32.gmra.mxu0 %vm42_vm0, %v22_v13 }
  0x1a   :  { %326 = vmatprep.mubr.msk.f32.mxu0 %vm361_vm1, %v360_v0 }
  0x1b   :  { %345 = vmatmul.mubr.msk.f32.gmra.mxu1 %vm42_vm0, %v29_v14 }
  0x1c   :  { %347 = vmatprep.mubr.msk.f32.mxu1 %vm361_vm1, %v360_v0 }
  0x1d   :  { %327 = vmatmul.mubr.msk.f32.gmra.mxu0 %vm42_vm0, %v23_v15 }
  0x1e   :  { %329 = vmatprep.mubr.msk.f32.mxu0 %vm361_vm1, %v360_v0 }
  0x1f   :  { %348 = vmatmul.mubr.msk.f32.gmra.mxu1 %vm42_vm0, %v30_v16 }
  0x21   :  { %330 = vmatmul.mubr.msk.f32.gmra.mxu0 %vm42_vm0, %v24_v17 }
  0xc9   :  { %v148_v23 = vpop.f32.mrf.mxu0 }
  0xca   :  { %v149_v25 = vadd.f32 %v474_v21, %v148_v23 }
  0xcb   :  { %v313_v26 = vpop.f32.mrf.mxu0  ;;  %v183_v27 = vpop.f32.mrf.mxu1 }
  0xcc   :  { %v241_v29 = vsel %vm228_vm2, %v149_v25, 0.0  ;;  %v184_v30 = vadd.f32 %v474_v21, %v183_v27 }
  0xcd   :  { %254 = vst.msk [vmem:[%s570_s4] sm:$0xff] %vm42_vm0, %v241_v29  ;;  %v153_v31 = vpop.f32.mrf.mxu0  ;;  %v334_v32 = vpop.f32.mrf.mxu1 }
  0xce   :  { %v248_v34 = vsel %vm235_vm3, %v184_v30, 0.0  ;;  %v154_v35 = vadd.f32 %v474_v21, %v153_v31 }
  0xcf   :  { %261 = vst.msk [vmem:[%s570_s4 + $0x38] sm:$0xff] %vm42_vm0, %v248_v34  ;;  %v316_v36 = vpop.f32.mrf.mxu0  ;;  %v188_v37 = vpop.f32.mrf.mxu1 }
  0xd0   :  { %v242_v39 = vsel %vm229_vm4, %v154_v35, 0.0  ;;  %v189_v40 = vadd.f32 %v474_v21, %v188_v37 }
  0xd1   :  { %255 = vst.msk [vmem:[%s570_s4 + $0x8] sm:$0xff] %vm42_vm0, %v242_v39  ;;  %v158_v41 = vpop.f32.mrf.mxu0  ;;  %v337_v42 = vpop.f32.mrf.mxu1 }
  0xd2   :  { %v249_v44 = vsel %vm236_vm5, %v189_v40, 0.0  ;;  %v159_v45 = vadd.f32 %v474_v21, %v158_v41 }
  0xd3   :  { %262 = vst.msk [vmem:[%s570_s4 + $0x40] sm:$0xff] %vm42_vm0, %v249_v44  ;;  %v319_v46 = vpop.f32.mrf.mxu0  ;;  %v193_v47 = vpop.f32.mrf.mxu1 }
  0xd4   :  { %v243_v49 = vsel %vm230_vm6, %v159_v45, 0.0  ;;  %v194_v50 = vadd.f32 %v474_v21, %v193_v47 }
  0xd5   :  { %256 = vst.msk [vmem:[%s570_s4 + $0x10] sm:$0xff] %vm42_vm0, %v243_v49  ;;  %v163_v51 = vpop.f32.mrf.mxu0  ;;  %v340_v52 = vpop.f32.mrf.mxu1 }
  0xd6   :  { %v250_v54 = vsel %vm237_vm7, %v194_v50, 0.0  ;;  %v164_v55 = vadd.f32 %v474_v21, %v163_v51 }
  0xd7   :  { %263 = vst.msk [vmem:[%s570_s4 + $0x48] sm:$0xff] %vm42_vm0, %v250_v54  ;;  %v322_v56 = vpop.f32.mrf.mxu0  ;;  %v198_v57 = vpop.f32.mrf.mxu1 }
  0xd8   :  { %v244_v59 = vsel %vm231_vm8, %v164_v55, 0.0  ;;  %v199_v60 = vadd.f32 %v474_v21, %v198_v57 }
  0xd9   :  { %257 = vst.msk [vmem:[%s570_s4 + $0x18] sm:$0xff] %vm42_vm0, %v244_v59  ;;  %v168_v61 = vpop.f32.mrf.mxu0  ;;  %v343_v62 = vpop.f32.mrf.mxu1 }
  0xda   :  { %v251_v0 = vsel %vm238_vm9, %v199_v60, 0.0  ;;  %v169_v1 = vadd.f32 %v474_v21, %v168_v61 }
  0xdb   :  { %264 = vst.msk [vmem:[%s570_s4 + $0x50] sm:$0xff] %vm42_vm0, %v251_v0  ;;  %v325_v2 = vpop.f32.mrf.mxu0  ;;  %v203_v3 = vpop.f32.mrf.mxu1 }
  0xdc   :  { %v245_v5 = vsel %vm232_vm10, %v169_v1, 0.0  ;;  %v204_v6 = vadd.f32 %v474_v21, %v203_v3 }
  0xdd   :  { %258 = vst.msk [vmem:[%s570_s4 + $0x20] sm:$0xff] %vm42_vm0, %v245_v5  ;;  %v173_v7 = vpop.f32.mrf.mxu0  ;;  %v346_v8 = vpop.f32.mrf.mxu1 }
  0xde   :  { %v252_v10 = vsel %vm239_vm11, %v204_v6, 0.0  ;;  %v174_v11 = vadd.f32 %v474_v21, %v173_v7 }
  0xdf   :  { %265 = vst.msk [vmem:[%s570_s4 + $0x58] sm:$0xff] %vm42_vm0, %v252_v10  ;;  %v328_v12 = vpop.f32.mrf.mxu0  ;;  %v208_v13 = vpop.f32.mrf.mxu1 }
  0xe0   :  { %v246_v14 = vsel %vm233_vm12, %v174_v11, 0.0  ;;  %v209_v15 = vadd.f32 %v474_v21, %v208_v13 }
  0xe1   :  { %259 = vst.msk [vmem:[%s570_s4 + $0x28] sm:$0xff] %vm42_vm0, %v246_v14  ;;  %v178_v16 = vpop.f32.mrf.mxu0  ;;  %v349_v17 = vpop.f32.mrf.mxu1 }
  0xe2   :  { %v253_v18 = vsel %vm240_vm13, %v209_v15, 0.0  ;;  %v179_v19 = vadd.f32 %v474_v21, %v178_v16 }
  0xe3   :  { %267 = vst.msk [vmem:[%s570_s4 + $0x60] sm:$0xf] %vm266_vm14, %v253_v18  ;;  %v331_v22 = vpop.f32.mrf.mxu0 }
  0xe4   :  { %v247_v23 = vsel %vm234_vm15, %v179_v19, 0.0 }
  0xe5   :  { %260 = vst.msk [vmem:[%s570_s4 + $0x30] sm:$0xff] %vm42_vm0, %v247_v23 }

</bundles_post_ra>
